<compile_context>
chip_gen: v7x
topology: tpu7x:2x2x1
jax: 0.10.0
libtpu: 0.0.40
codegen_flags: <defaults>
</compile_context>

<pallas_src>
import math

import jax
import jax.numpy as jnp
from jax.experimental import pallas as pl
from jax.experimental.pallas import tpu as pltpu


_LANE_CHOICES = (512, 256, 128)     # lane-dense widths (multiples of 128)
_TARGET_BLOCK_BYTES = 4 << 20       # ~4 MiB per block, per array
_MIN_GRID_STEPS = 4                 # keep the pipeline (and both v7x TCs) busy
_PALLAS_MIN_ELEMS = 1 << 16         # 64K elements: below this, XLA-fused add wins
_VMEM_LIMIT_BYTES = 32 << 20        # 3 arrays x 2 bufs x 4 MiB = 24 MiB resident


def _add_kernel(a_ref, b_ref, o_ref):
    o_ref[...] = a_ref[...] + b_ref[...]


def _round_up(x, m):
    return ((x + m - 1) // m) * m


def _pallas_add_2d(a2, b2):
    """Tiled elementwise add on a lane-dense (rows, lanes) view."""
    rows, lanes = a2.shape
    itemsize = jnp.dtype(a2.dtype).itemsize

    # Largest row-tile that keeps a block at ~_TARGET_BLOCK_BYTES (mult. of 8).
    max_tile_rows = max(8, (_TARGET_BLOCK_BYTES // (lanes * itemsize)) // 8 * 8)
    # But always split into >= _MIN_GRID_STEPS steps so DMA/writeback overlap.
    tile_rows = min(max_tile_rows, _round_up(pl.cdiv(rows, _MIN_GRID_STEPS), 8))
    tile_rows = min(tile_rows, rows)   # full-extent block is always legal
    grid = (pl.cdiv(rows, tile_rows),)

    # TODO(synk): on v7x, verify in the trace that "parallel" shards the row
    # axis across both TensorCores; otherwise switch to an explicit core split.
    return pl.pallas_call(
        _add_kernel,
        out_shape=jax.ShapeDtypeStruct((rows, lanes), a2.dtype),
        grid=grid,
        in_specs=[
            pl.BlockSpec((tile_rows, lanes), lambda i: (i, 0)),
            pl.BlockSpec((tile_rows, lanes), lambda i: (i, 0)),
        ],
        out_specs=pl.BlockSpec((tile_rows, lanes), lambda i: (i, 0)),
        compiler_params=pltpu.CompilerParams(
            dimension_semantics=("parallel",),
            vmem_limit_bytes=_VMEM_LIMIT_BYTES,
        ),
    )(a2, b2)


def pallas_add(x142, x128):
    """Elementwise add, equivalent to M.forward(x142, x128)."""
    # Broadcasting / mixed-dtype adds: defer to XLA (module spec uses equal shapes).
    if x142.shape != x128.shape or x142.dtype != x128.dtype:
        return x142 + x128

    orig_shape = x142.shape
    total = math.prod(orig_shape)

    # Tiny / small inputs: a standalone kernel launch is pure overhead.
    if total < _PALLAS_MIN_ELEMS:
        return x142 + x128

    a_flat = x142.reshape(-1)
    b_flat = x128.reshape(-1)

    # Clean path: some lane width in {512, 256, 128} divides the element count.
    lanes = next((l for l in _LANE_CHOICES if total % l == 0), None)
    if lanes is not None:
        out2 = _pallas_add_2d(a_flat.reshape(-1, lanes), b_flat.reshape(-1, lanes))
        return out2.reshape(orig_shape)

    # Ragged path: Pallas on the largest 128-aligned prefix, XLA add on the
    # (<128-element) tail.  No padded input copies, no output slice-of-pad.
    main = (total // 128) * 128
    lanes = next(l for l in _LANE_CHOICES if main % l == 0)
    out_main = _pallas_add_2d(
        a_flat[:main].reshape(-1, lanes), b_flat[:main].reshape(-1, lanes)
    ).reshape(-1)
    out_tail = a_flat[main:] + b_flat[main:]
    return jnp.concatenate([out_main, out_tail]).reshape(orig_shape)


def _check(shape, k1, k2):
    a = jax.random.normal(k1, shape, dtype=jnp.float32)
    b = jax.random.normal(k2, shape, dtype=jnp.float32)
    y = pallas_add(a, b)
    jax.block_until_ready(y)
    ref = a + b
    assert y.shape == ref.shape
    assert jnp.allclose(y, ref, atol=1e-6), f"mismatch vs reference add for {shape}"


if __name__ == "__main__":
    key = jax.random.PRNGKey(0)
    ks = jax.random.split(key, 8)

    # Exact module-spec shape (Pallas path, 512-lane view, 4-step grid).
    _check((1, 48, 56, 56), ks[0], ks[1])

    # Small shape (XLA-fusion bypass path).
    _check((2, 4, 16, 16), ks[2], ks[3])

    # Larger shape (Pallas path, bigger tiles, multi-step grid).
    _check((1, 48, 112, 112), ks[4], ks[5])

    # Non-128-aligned element count (Pallas prefix + XLA tail path).
    _check((1, 67, 35, 37), ks[6], ks[7])

    print("KERNEL_OK")
</pallas_src>

<mosaic_0001>
module attributes {stable_mosaic.version = 11 : i64} {
  func.func @_add_kernel(%arg0: i32, %arg1: memref<80x512xf32, #tpu.memory_space<vmem>>, %arg2: memref<80x512xf32, #tpu.memory_space<vmem>>, %arg3: memref<80x512xf32, #tpu.memory_space<vmem>>) attributes {dimension_semantics = [#tpu.dimension_semantics<parallel>], iteration_bounds = array<i64: 4>, scalar_prefetch = 0 : i64, scratch_operands = 0 : i64, tpu.core_type = #tpu.core_type<tc>, window_params = [{transform_indices = @transform_0, window_bounds = array<i64: 80, 512>}, {transform_indices = @transform_1, window_bounds = array<i64: 80, 512>}, {transform_indices = @transform_2, window_bounds = array<i64: 80, 512>}]} {
    %c0 = arith.constant 0 : index
    %c0_0 = arith.constant 0 : index
    %0 = vector.load %arg1[%c0, %c0_0] : memref<80x512xf32, #tpu.memory_space<vmem>>, vector<80x512xf32>
    %c0_1 = arith.constant 0 : index
    %c0_2 = arith.constant 0 : index
    %1 = vector.load %arg2[%c0_1, %c0_2] : memref<80x512xf32, #tpu.memory_space<vmem>>, vector<80x512xf32>
    %2 = arith.addf %0, %1 : vector<80x512xf32>
    %c0_3 = arith.constant 0 : index
    %c0_4 = arith.constant 0 : index
    %3 = vector.load %arg3[%c0_3, %c0_4] : memref<80x512xf32, #tpu.memory_space<vmem>>, vector<80x512xf32>
    tpu.vector_store %arg3[%c0_3, %c0_4], %2 {strides = array<i32>} : memref<80x512xf32, #tpu.memory_space<vmem>>, vector<80x512xf32>,
    return
  }
  func.func @transform_0(%arg0: i32) -> (i32, i32) {
    %c0_i32 = arith.constant 0 : i32
    %c0_i32_0 = arith.constant 0 : i32
    return %arg0, %c0_i32 : i32, i32
  }
  func.func @transform_1(%arg0: i32) -> (i32, i32) {
    %c0_i32 = arith.constant 0 : i32
    %c0_i32_0 = arith.constant 0 : i32
    return %arg0, %c0_i32 : i32, i32
  }
  func.func @transform_2(%arg0: i32) -> (i32, i32) {
    %c0_i32 = arith.constant 0 : i32
    %c0_i32_0 = arith.constant 0 : i32
    return %arg0, %c0_i32 : i32, i32
  }
}

</mosaic_0001>

<bundles_post_ra>
// kernel: tpu_custom_call.1
= control target key start
LH: loop header
LB: loop body
LE: loop exit
PB: predicated region body
PF: predicated region fallthrough
CT: control target
= control target key end

     0   :  { %7 = vsyncpa [#allocation3], 0  ;;  %s1103_s0 = inlined_call_operand.hbm [shape: f32[294,512], index: 0, kind: input, shape index: {}]   ;;  %s1104_s1 = inlined_call_operand.hbm [shape: f32[294,512], index: 1, kind: input, shape index: {}]   ;;  %s1105_s2 = inlined_call_operand.hbm [shape: f32[294,512], index: 2, kind: output, shape index: {}]  }
   0x1   :  { %9 = vsyncpa [#allocation3 + $0x1], 0 }
   0x2   :  { %10 = vsyncpa [#allocation6], 0 }
   0x3   :  { %12 = vsyncpa [#allocation6 + $0x1], 0 }
   0x4   :  { %13 = vsyncpa [#allocation4], 0 }
   0x5   :  { %15 = vsyncpa [#allocation4 + $0x1], 0  ;;  %s754_s9 = smov 0   ;;  %s756_s10 = smov 0  }
   0x6   :  { %s758_s11 = smov 0   ;;  %s760_s12 = smov 0  }
   0x7 LB: > { %s775_s13 = sadd.s32 4294967295, %s728_s12   ;;  %s514_s14 = sadd.s32 4294967294, %s728_s12   ;;  %s728_s12 = sphi %s760_s12, %s1115_s12   ;;  %s724_s11 = sphi %s758_s11, %s1114_s11   ;;  %s720_s10 = sphi %s756_s10, %s1113_s10   ;;  %s716_s9 = sphi %s754_s9, %s1112_s9  }
   0x8   : > { %s779_s15 = sadd.s32 1, %s728_s12   ;;  %s28_s16 = sadd.s32 1, %s724_s11 }
   0x9   : > { %s25_s17 = ssub.s32 %s728_s12, %s779_s15  ;;  %p35_p0 = scmp.ne.s32.totalorder %s724_s11, %s720_s10 }
   0xa   : > { %p26_p1 = scmp.eq.s32.totalorder %s25_s17, 0  ;;  %p36_p2 = scmp.eq.s32.totalorder %s728_s12, 0 }
   0xb   : > { %p41_p3 = scmp.ne.s32.totalorder %s720_s10, %s716_s9  ;;  %p42_p4 = scmp.eq.s32.totalorder %s775_s13, 0 }
   0xc   : > { %s791_s18 = scalar_select %p26_p1, %s724_s11, %s28_s16  }
   0xd   : > { %p793_p5 = por %p36_p2, %p35_p0  ;;  %p797_p6 = por %p42_p4, %p41_p3 }
   0xe   : > { %p91_p7 = scmp.eq.s32.totalorder %s775_s13, 3  ;;  %p97_p8 = scmp.eq.s32.totalorder %s514_s14, 3 }
   0xf   : > { %p516_p11 = scmp.ge.s32.totalorder %s728_s12, 4 }
  0x10   : > { %p802_p9 = por %p91_p7, %p35_p0  ;;  %p806_p10 = por %p97_p8, %p41_p3 }
  0x11   : > { %113 = sbr.rel (%p516_p11) target bundleno = 94 (0x5e), region = 16 }
  0x12   : > { %s1108_s21 = scalar_select %p802_p9, 1, 0 }
  0x13   : > { %s1109_s22 = scalar_select %p806_p10, 1, 0 }
  0x18   : > { %116 = sbr.rel (!%p793_p5) target bundleno = 59 (0x3b), region = 20  ;;  %s117_s23 = sand.u32 (%p793_p5), 1, %s724_s11  }
  0x19   : > { %s122_s24 = smul.u32 (%p793_p5), 10, %s728_s12  ;;  %s818_s29 = scalar_lea.sflag (%p793_p5), [#allocation3], %s117_s23 }
  0x1a   : > { %s553_s25 = smul.u32 (%p793_p5), 320, %s117_s23 }
  0x1b   : > { %s123_s26 = ssub.s32 (%p793_p5), 37, %s122_s24 }
  0x1c   : > { %p124_p12 = scmp.lt.s32.totalorder (%p793_p5), %s123_s26, 10  ;;  %s121_s30 = scalar_lea.vmem (%p793_p5), [#allocation2], %s553_s25 }
  0x1f   : > { %s1117_s26 = smov (!%p124_p12, %s123_s26), 10 }
  0x20   : > { %s815_s27 = sshll.u32 %s1117_s26, 9 }
  0x21   : > { %s129_s28 = ssub.s32 5120, %s815_s27 }
  0x22   : > { %130 = vsyncadd %s818_s29, %s129_s28  ;;  %p519_p13 = scmp.ne.s32.totalorder %s815_s27, 0  ;;  %s550_s3 = smul.u32 5120, %s728_s12 }
  0x23   : > { %s136_s4 = sshll.u32 %s121_s30, 4  ;;  %s606_s17 = scalar_lea.hbm %s1103_s0, 18944  ;;  %s828_s4 = int_to_ptr.vmem [resolvable:$true] %s136_s4 }
  0x24   : > { %s826_s7 = scalar_lea.hbm %s1103_s0, %s550_s3 }
  0x25   : > { %s602_s8 = scalar_lea.hbm %s826_s7, %s815_s27  ;;  %p607_p3 = scmp.lt.u32.totalorder %s826_s7, %s1103_s0 }
  0x26   : > { %p603_p0 = scmp.ne.s32.totalorder %s826_s7, %s602_s8  ;;  %p608_p4 = scmp.lt.u32.totalorder %s606_s17, %s602_s8 }
  0x27   : > { %p610_p8 = scmp.lt.u32.totalorder %s602_s8, %s826_s7 }
  0x28   : > { %p604_p1 = pnand %p603_p0, %p519_p13  ;;  %p609_p7 = por %p608_p4, %p607_p3 }
  0x2a   : > { %p605_p2 = pneg %p604_p1  ;;  %p611_p11 = por %p610_p8, %p609_p7 }
  0x2c   : > { %p612_p12 = pnand %p611_p11, %p605_p2 }
  0x2e   : > { %615 = shalt.err (!%p612_p12)
}
  0x2f   : > { %s616_s25 = scalar_lea.vmem %s828_s4, %s815_s27  ;;  %s730_s26 = smov [#allocation2]  }
  0x30   : > { %p617_p0 = scmp.ne.s32.totalorder %s828_s4, %s616_s25  ;;  %s620_s28 = sshll.u32 %s730_s26, 4  ;;  %s621_s28 = int_to_ptr.vmem [resolvable:$false] %s620_s28 }
  0x31   : > { %s622_s30 = scalar_lea.vmem %s621_s28, 10240  ;;  %p623_p9 = scmp.lt.s32.totalorder %s828_s4, %s621_s28 }
  0x32   : > { %p618_p1 = pnand %p617_p0, %p519_p13  ;;  %p624_p3 = scmp.lt.s32.totalorder %s622_s30, %s616_s25 }
  0x34   : > { %p619_p10 = pneg %p618_p1  ;;  %p625_p4 = por %p624_p3, %p623_p9 }
  0x36   : > { %p626_p7 = pnand %p625_p4, %p619_p10 }
  0x38   : > { %629 = shalt.err (!%p626_p7)
}
  0x39   : > { %s731_s3 = smov 512   ;;  %s732_s5 = smov 32  }
  0x3a   : > { %142 = dma.hbm_to_vmem [thread:$0]  (%p519_p13), %s826_s7, %s815_s27, %s828_s4, %s818_s29, %s731_s3, %s731_s3, %s732_s5  }
  0x3b PF: > { %145 = sbr.rel (!%p793_p5) target bundleno = 94 (0x5e), region = 24  ;;  %s146_s6 = sand.u32 (%p793_p5), 1, %s724_s11  }
  0x3c   : > { %s151_s8 = smul.u32 (%p793_p5), 10, %s728_s12  ;;  %s862_s24 = scalar_lea.sflag (%p793_p5), [#allocation6], %s146_s6 }
  0x3d   : > { %s554_s14 = smul.u32 (%p793_p5), 320, %s146_s6 }
  0x3e   : > { %s152_s16 = ssub.s32 (%p793_p5), 37, %s151_s8 }
  0x3f   : > { %p153_p9 = scmp.lt.s32.totalorder (%p793_p5), %s152_s16, 10  ;;  %s150_s27 = scalar_lea.vmem (%p793_p5), [#allocation5], %s554_s14 }
  0x42   : > { %s1119_s16 = smov (!%p153_p9, %s152_s16), 10 }
  0x43   : > { %s859_s17 = sshll.u32 %s1119_s16, 9 }
  0x44   : > { %s158_s23 = ssub.s32 5120, %s859_s17 }
  0x45   : > { %159 = vsyncadd %s862_s24, %s158_s23  ;;  %p526_p5 = scmp.ne.s32.totalorder %s859_s17, 0  ;;  %s551_s19 = smul.u32 5120, %s728_s12 }
  0x46   : > { %s165_s29 = sshll.u32 %s150_s27, 4  ;;  %s634_s3 = scalar_lea.hbm %s1104_s1, 18944  ;;  %s872_s29 = int_to_ptr.vmem [resolvable:$true] %s165_s29 }
  0x47   : > { %s870_s25 = scalar_lea.hbm %s1104_s1, %s551_s19 }
  0x48   : > { %s630_s26 = scalar_lea.hbm %s870_s25, %s859_s17  ;;  %p635_p8 = scmp.lt.u32.totalorder %s870_s25, %s1104_s1 }
  0x49   : > { %p631_p10 = scmp.ne.s32.totalorder %s870_s25, %s630_s26  ;;  %p636_p11 = scmp.lt.u32.totalorder %s634_s3, %s630_s26 }
  0x4a   : > { %p638_p0 = scmp.lt.u32.totalorder %s630_s26, %s870_s25 }
  0x4b   : > { %p632_p13 = pnand %p631_p10, %p526_p5  ;;  %p637_p12 = por %p636_p11, %p635_p8 }
  0x4d   : > { %p633_p2 = pneg %p632_p13  ;;  %p639_p1 = por %p638_p0, %p637_p12 }
  0x4f   : > { %p640_p3 = pnand %p639_p1, %p633_p2 }
  0x51   : > { %643 = shalt.err (!%p640_p3)
}
  0x52   : > { %s644_s8 = scalar_lea.vmem %s872_s29, %s859_s17  ;;  %s733_s14 = smov [#allocation5]  }
  0x53   : > { %p645_p4 = scmp.ne.s32.totalorder %s872_s29, %s644_s8  ;;  %s648_s16 = sshll.u32 %s733_s14, 4  ;;  %s649_s16 = int_to_ptr.vmem [resolvable:$false] %s648_s16 }
  0x54   : > { %s650_s23 = scalar_lea.vmem %s649_s16, 10240  ;;  %p651_p10 = scmp.lt.s32.totalorder %s872_s29, %s649_s16 }
  0x55   : > { %p646_p7 = pnand %p645_p4, %p526_p5  ;;  %p652_p13 = scmp.lt.s32.totalorder %s650_s23, %s644_s8 }
  0x57   : > { %p647_p9 = pneg %p646_p7  ;;  %p653_p8 = por %p652_p13, %p651_p10 }
  0x59   : > { %p654_p11 = pnand %p653_p8, %p647_p9 }
  0x5b   : > { %657 = shalt.err (!%p654_p11)
}
  0x5c   : > { %s734_s27 = smov 512   ;;  %s735_s19 = smov 32  }
  0x5d   : > { %171 = dma.hbm_to_vmem [thread:$0]  (%p526_p5), %s870_s25, %s859_s17, %s872_s29, %s862_s24, %s734_s27, %s734_s27, %s735_s19  }
  0x5e PF: > { %p531_p2 = scmp.ge.s32.totalorder %s728_s12, 1  ;;  %p173_p12 = scmp.lt.s32.totalorder %s728_s12, 5 }
  0x60   : > { %p174_p0 = pnand %p531_p2, %p173_p12 }
  0x61   : > { %s902_s4 = sand.u32 (!%p174_p0), 1, %s720_s10  }
  0x62   : > { %177 = sbr.rel (%p174_p0) target bundleno = 171 (0xab), region = 28  ;;  %s180_s26 = scalar_lea.sflag (!%p174_p0), [#allocation3], %s902_s4 }
  0x63   : > { %s555_s7 = smul.u32 (!%p174_p0), 320, %s902_s4 }
  0x65   : > { %s906_s28 = scalar_lea.vmem (!%p174_p0), [#allocation2], %s555_s7 }
  0x69   : > { %703 = dma.done.wait (%p797_p6), %s180_s26, 5120  }
  0x6a   : > { %705 = vsyncadd (%p797_p6), %s180_s26, 4294962176  ;;  %s189_s17 = scalar_lea.sflag [#allocation6], %s902_s4  ;;  %s913_s24 = scalar_lea.vmem [#allocation5], %s555_s7 }
  0x6b   : > { %707 = dma.done.wait (%p797_p6), %s189_s17, 5120  }
  0x6c   : > { %709 = vsyncadd (%p797_p6), %s189_s17, 4294962176  ;;  %v236_v0 = vld [vmem:[%s906_s28] sm:$0xff]  ;;  %v237_v2 = vld [vmem:[%s906_s28 + $0x8] sm:$0xff]  ;;  %s928_s20 = scalar_lea.vmem [#allocation7], %s555_s7  ;;  %s397_s29 = scalar_lea.sflag [#allocation4], %s902_s4 }
  0x6d   : > { %v276_v1 = vld [vmem:[%s913_s24] sm:$0xff]  ;;  %v277_v4 = vld [vmem:[%s913_s24 + $0x8] sm:$0xff]  ;;  %v238_v5 = vld [vmem:[%s906_s28 + $0x10] sm:$0xff]  ;;  %p1110_p6 = scmp.ne.s32.totalorder %s1108_s21, 0 }
  0x6e   : > { %v316_v3 = vadd.f32 %v276_v1, %v236_v0  ;;  %v278_v6 = vld [vmem:[%s913_s24 + $0x10] sm:$0xff]  ;;  %v317_v7 = vadd.f32 %v277_v4, %v237_v2  ;;  %v239_v9 = vld [vmem:[%s906_s28 + $0x18] sm:$0xff]  ;;  %v240_v11 = vld [vmem:[%s906_s28 + $0x20] sm:$0xff]  ;;  %s404_s25 = smul.u32 (%p1110_p6), 10, %s775_s13 }
  0x6f   : > { %v318_v8 = vadd.f32 %v278_v6, %v238_v5  ;;  %v279_v10 = vld [vmem:[%s913_s24 + $0x18] sm:$0xff]  ;;  %v280_v13 = vld [vmem:[%s913_s24 + $0x20] sm:$0xff]  ;;  %v241_v14 = vld [vmem:[%s906_s28 + $0x28] sm:$0xff] }
  0x70   : > { %356 = vst [vmem:[%s928_s20] sm:$0xff] %v316_v3  ;;  %v319_v12 = vadd.f32 %v279_v10, %v239_v9  ;;  %v281_v15 = vld [vmem:[%s913_s24 + $0x28] sm:$0xff]  ;;  %357 = vst [vmem:[%s928_s20 + $0x8] sm:$0xff] %v317_v7  ;;  %v320_v16 = vadd.f32 %v280_v13, %v240_v11  ;;  %v242_v18 = vld [vmem:[%s906_s28 + $0x30] sm:$0xff]  ;;  %s405_s30 = ssub.s32 (%p1110_p6), 37, %s404_s25 }
  0x71   : > { %358 = vst [vmem:[%s928_s20 + $0x10] sm:$0xff] %v318_v8  ;;  %v321_v17 = vadd.f32 %v281_v15, %v241_v14  ;;  %v282_v19 = vld [vmem:[%s913_s24 + $0x30] sm:$0xff]  ;;  %v243_v20 = vld [vmem:[%s906_s28 + $0x38] sm:$0xff]  ;;  %v244_v23 = vld [vmem:[%s906_s28 + $0x40] sm:$0xff]  ;;  %p406_p5 = scmp.lt.s32.totalorder (%p1110_p6), %s405_s30, 10 }
  0x72   : > { %359 = vst [vmem:[%s928_s20 + $0x18] sm:$0xff] %v319_v12  ;;  %v322_v21 = vadd.f32 %v282_v19, %v242_v18  ;;  %v283_v22 = vld [vmem:[%s913_s24 + $0x38] sm:$0xff]  ;;  %v284_v24 = vld [vmem:[%s913_s24 + $0x40] sm:$0xff]  ;;  %360 = vst [vmem:[%s928_s20 + $0x20] sm:$0xff] %v320_v16 }
  0x73   : > { %361 = vst [vmem:[%s928_s20 + $0x28] sm:$0xff] %v321_v17  ;;  %v323_v25 = vadd.f32 %v283_v22, %v243_v20  ;;  %v324_v26 = vadd.f32 %v284_v24, %v244_v23  ;;  %v245_v27 = vld [vmem:[%s906_s28 + $0x48] sm:$0xff]  ;;  %v246_v29 = vld [vmem:[%s906_s28 + $0x50] sm:$0xff]  ;;  %v247_v32 = vld [vmem:[%s906_s28 + $0x58] sm:$0xff] }
  0x74   : > { %v285_v28 = vld [vmem:[%s913_s24 + $0x48] sm:$0xff]  ;;  %362 = vst [vmem:[%s928_s20 + $0x30] sm:$0xff] %v322_v21  ;;  %v286_v31 = vld [vmem:[%s913_s24 + $0x50] sm:$0xff]  ;;  %v287_v33 = vld [vmem:[%s913_s24 + $0x58] sm:$0xff] }
  0x75   : > { %v325_v30 = vadd.f32 %v285_v28, %v245_v27  ;;  %363 = vst [vmem:[%s928_s20 + $0x38] sm:$0xff] %v323_v25  ;;  %364 = vst [vmem:[%s928_s20 + $0x40] sm:$0xff] %v324_v26  ;;  %v326_v34 = vadd.f32 %v286_v31, %v246_v29  ;;  %v327_v35 = vadd.f32 %v287_v33, %v247_v32  ;;  %v248_v36 = vld [vmem:[%s906_s28 + $0x60] sm:$0xff]  ;;  %v249_v38 = vld [vmem:[%s906_s28 + $0x68] sm:$0xff] }
  0x76   : > { %v288_v37 = vld [vmem:[%s913_s24 + $0x60] sm:$0xff]  ;;  %v289_v40 = vld [vmem:[%s913_s24 + $0x68] sm:$0xff]  ;;  %v250_v41 = vld [vmem:[%s906_s28 + $0x70] sm:$0xff] }
  0x77   : > { %365 = vst [vmem:[%s928_s20 + $0x48] sm:$0xff] %v325_v30  ;;  %v328_v39 = vadd.f32 %v288_v37, %v248_v36  ;;  %v290_v42 = vld [vmem:[%s913_s24 + $0x70] sm:$0xff]  ;;  %366 = vst [vmem:[%s928_s20 + $0x50] sm:$0xff] %v326_v34  ;;  %v329_v43 = vadd.f32 %v289_v40, %v249_v38  ;;  %v251_v45 = vld [vmem:[%s906_s28 + $0x78] sm:$0xff] }
  0x78   : > { %367 = vst [vmem:[%s928_s20 + $0x58] sm:$0xff] %v327_v35  ;;  %v330_v44 = vadd.f32 %v290_v42, %v250_v41  ;;  %v291_v46 = vld [vmem:[%s913_s24 + $0x78] sm:$0xff]  ;;  %v252_v47 = vld [vmem:[%s906_s28 + $0x80] sm:$0xff]  ;;  %v253_v50 = vld [vmem:[%s906_s28 + $0x88] sm:$0xff] }
  0x79   : > { %368 = vst [vmem:[%s928_s20 + $0x60] sm:$0xff] %v328_v39  ;;  %v331_v48 = vadd.f32 %v291_v46, %v251_v45  ;;  %v292_v49 = vld [vmem:[%s913_s24 + $0x80] sm:$0xff]  ;;  %v293_v51 = vld [vmem:[%s913_s24 + $0x88] sm:$0xff]  ;;  %369 = vst [vmem:[%s928_s20 + $0x68] sm:$0xff] %v329_v43 }
  0x7a   : > { %370 = vst [vmem:[%s928_s20 + $0x70] sm:$0xff] %v330_v44  ;;  %v332_v52 = vadd.f32 %v292_v49, %v252_v47  ;;  %v333_v53 = vadd.f32 %v293_v51, %v253_v50  ;;  %v254_v54 = vld [vmem:[%s906_s28 + $0x90] sm:$0xff]  ;;  %v255_v56 = vld [vmem:[%s906_s28 + $0x98] sm:$0xff]  ;;  %v256_v59 = vld [vmem:[%s906_s28 + $0xa0] sm:$0xff] }
  0x7b   : > { %v294_v55 = vld [vmem:[%s913_s24 + $0x90] sm:$0xff]  ;;  %371 = vst [vmem:[%s928_s20 + $0x78] sm:$0xff] %v331_v48  ;;  %v295_v58 = vld [vmem:[%s913_s24 + $0x98] sm:$0xff]  ;;  %v296_v60 = vld [vmem:[%s913_s24 + $0xa0] sm:$0xff] }
  0x7c   : > { %v334_v57 = vadd.f32 %v294_v55, %v254_v54  ;;  %372 = vst [vmem:[%s928_s20 + $0x80] sm:$0xff] %v332_v52  ;;  %373 = vst [vmem:[%s928_s20 + $0x88] sm:$0xff] %v333_v53  ;;  %v335_v61 = vadd.f32 %v295_v58, %v255_v56  ;;  %v336_v62 = vadd.f32 %v296_v60, %v256_v59  ;;  %v257_v63 = vld [vmem:[%s906_s28 + $0xa8] sm:$0xff]  ;;  %v258_v1 = vld [vmem:[%s906_s28 + $0xb0] sm:$0xff] }
  0x7d   : > { %v297_v0 = vld [vmem:[%s913_s24 + $0xa8] sm:$0xff]  ;;  %v298_v3 = vld [vmem:[%s913_s24 + $0xb0] sm:$0xff]  ;;  %v259_v4 = vld [vmem:[%s906_s28 + $0xb8] sm:$0xff] }
  0x7e   : > { %374 = vst [vmem:[%s928_s20 + $0x90] sm:$0xff] %v334_v57  ;;  %v337_v2 = vadd.f32 %v297_v0, %v257_v63  ;;  %v299_v5 = vld [vmem:[%s913_s24 + $0xb8] sm:$0xff]  ;;  %375 = vst [vmem:[%s928_s20 + $0x98] sm:$0xff] %v335_v61  ;;  %v338_v6 = vadd.f32 %v298_v3, %v258_v1  ;;  %v260_v8 = vld [vmem:[%s906_s28 + $0xc0] sm:$0xff] }
  0x7f   : > { %376 = vst [vmem:[%s928_s20 + $0xa0] sm:$0xff] %v336_v62  ;;  %v339_v7 = vadd.f32 %v299_v5, %v259_v4  ;;  %v300_v9 = vld [vmem:[%s913_s24 + $0xc0] sm:$0xff]  ;;  %v261_v10 = vld [vmem:[%s906_s28 + $0xc8] sm:$0xff]  ;;  %v262_v13 = vld [vmem:[%s906_s28 + $0xd0] sm:$0xff] }
  0x80   : > { %377 = vst [vmem:[%s928_s20 + $0xa8] sm:$0xff] %v337_v2  ;;  %v340_v11 = vadd.f32 %v300_v9, %v260_v8  ;;  %v301_v12 = vld [vmem:[%s913_s24 + $0xc8] sm:$0xff]  ;;  %v302_v14 = vld [vmem:[%s913_s24 + $0xd0] sm:$0xff]  ;;  %378 = vst [vmem:[%s928_s20 + $0xb0] sm:$0xff] %v338_v6 }
  0x81   : > { %379 = vst [vmem:[%s928_s20 + $0xb8] sm:$0xff] %v339_v7  ;;  %v341_v15 = vadd.f32 %v301_v12, %v261_v10  ;;  %v342_v16 = vadd.f32 %v302_v14, %v262_v13  ;;  %v263_v17 = vld [vmem:[%s906_s28 + $0xd8] sm:$0xff]  ;;  %v264_v19 = vld [vmem:[%s906_s28 + $0xe0] sm:$0xff]  ;;  %v265_v22 = vld [vmem:[%s906_s28 + $0xe8] sm:$0xff] }
  0x82   : > { %v303_v18 = vld [vmem:[%s913_s24 + $0xd8] sm:$0xff]  ;;  %380 = vst [vmem:[%s928_s20 + $0xc0] sm:$0xff] %v340_v11  ;;  %v304_v21 = vld [vmem:[%s913_s24 + $0xe0] sm:$0xff]  ;;  %v305_v23 = vld [vmem:[%s913_s24 + $0xe8] sm:$0xff] }
  0x83   : > { %v343_v20 = vadd.f32 %v303_v18, %v263_v17  ;;  %381 = vst [vmem:[%s928_s20 + $0xc8] sm:$0xff] %v341_v15  ;;  %382 = vst [vmem:[%s928_s20 + $0xd0] sm:$0xff] %v342_v16  ;;  %v344_v24 = vadd.f32 %v304_v21, %v264_v19  ;;  %v345_v25 = vadd.f32 %v305_v23, %v265_v22  ;;  %v266_v26 = vld [vmem:[%s906_s28 + $0xf0] sm:$0xff]  ;;  %v267_v28 = vld [vmem:[%s906_s28 + $0xf8] sm:$0xff] }
  0x84   : > { %v306_v27 = vld [vmem:[%s913_s24 + $0xf0] sm:$0xff]  ;;  %v307_v30 = vld [vmem:[%s913_s24 + $0xf8] sm:$0xff]  ;;  %v268_v31 = vld [vmem:[%s906_s28 + $0x100] sm:$0xff] }
  0x85   : > { %383 = vst [vmem:[%s928_s20 + $0xd8] sm:$0xff] %v343_v20  ;;  %v346_v29 = vadd.f32 %v306_v27, %v266_v26  ;;  %v308_v32 = vld [vmem:[%s913_s24 + $0x100] sm:$0xff]  ;;  %384 = vst [vmem:[%s928_s20 + $0xe0] sm:$0xff] %v344_v24  ;;  %v347_v33 = vadd.f32 %v307_v30, %v267_v28  ;;  %v269_v35 = vld [vmem:[%s906_s28 + $0x108] sm:$0xff] }
  0x86   : > { %385 = vst [vmem:[%s928_s20 + $0xe8] sm:$0xff] %v345_v25  ;;  %v348_v34 = vadd.f32 %v308_v32, %v268_v31  ;;  %v309_v36 = vld [vmem:[%s913_s24 + $0x108] sm:$0xff]  ;;  %v270_v37 = vld [vmem:[%s906_s28 + $0x110] sm:$0xff]  ;;  %v271_v40 = vld [vmem:[%s906_s28 + $0x118] sm:$0xff] }
  0x87   : > { %386 = vst [vmem:[%s928_s20 + $0xf0] sm:$0xff] %v346_v29  ;;  %v349_v38 = vadd.f32 %v309_v36, %v269_v35  ;;  %v310_v39 = vld [vmem:[%s913_s24 + $0x110] sm:$0xff]  ;;  %v311_v41 = vld [vmem:[%s913_s24 + $0x118] sm:$0xff]  ;;  %387 = vst [vmem:[%s928_s20 + $0xf8] sm:$0xff] %v347_v33 }
  0x88   : > { %388 = vst [vmem:[%s928_s20 + $0x100] sm:$0xff] %v348_v34  ;;  %v350_v42 = vadd.f32 %v310_v39, %v270_v37  ;;  %v351_v43 = vadd.f32 %v311_v41, %v271_v40  ;;  %v272_v44 = vld [vmem:[%s906_s28 + $0x120] sm:$0xff]  ;;  %v273_v46 = vld [vmem:[%s906_s28 + $0x128] sm:$0xff]  ;;  %v274_v49 = vld [vmem:[%s906_s28 + $0x130] sm:$0xff]  ;;  %403 = sbr.rel (!%p1110_p6) target bundleno = 171 (0xab), region = 40 }
  0x89   : > { %v312_v45 = vld [vmem:[%s913_s24 + $0x120] sm:$0xff]  ;;  %389 = vst [vmem:[%s928_s20 + $0x108] sm:$0xff] %v349_v38  ;;  %v313_v48 = vld [vmem:[%s913_s24 + $0x128] sm:$0xff]  ;;  %v314_v50 = vld [vmem:[%s913_s24 + $0x130] sm:$0xff] }
  0x8a   : > { %v352_v47 = vadd.f32 %v312_v45, %v272_v44  ;;  %390 = vst [vmem:[%s928_s20 + $0x110] sm:$0xff] %v350_v42  ;;  %391 = vst [vmem:[%s928_s20 + $0x118] sm:$0xff] %v351_v43  ;;  %v353_v51 = vadd.f32 %v313_v48, %v273_v46  ;;  %v354_v52 = vadd.f32 %v314_v50, %v274_v49  ;;  %v275_v53 = vld [vmem:[%s906_s28 + $0x138] sm:$0xff] }
  0x8b   : > { %v315_v54 = vld [vmem:[%s913_s24 + $0x138] sm:$0xff] }
  0x8c   : > { %392 = vst [vmem:[%s928_s20 + $0x120] sm:$0xff] %v352_v47  ;;  %v355_v55 = vadd.f32 %v315_v54, %v275_v53  ;;  %393 = vst [vmem:[%s928_s20 + $0x128] sm:$0xff] %v353_v51 }
  0x8d   : > { %394 = vst [vmem:[%s928_s20 + $0x130] sm:$0xff] %v354_v52 }
  0x8e   : > { %395 = vst [vmem:[%s928_s20 + $0x138] sm:$0xff] %v355_v55 }
  0x8f   : > { %s1121_s30 = smov (!%p406_p5, %s405_s30), 10 }
  0x90   : > { %s1045_s3 = sshll.u32 %s1121_s30, 9 }
  0x91   : > { %s411_s5 = ssub.s32 5120, %s1045_s3 }
  0x92   : > { %412 = vsyncadd %s397_s29, %s411_s5  ;;  %p534_p1 = scmp.ne.s32.totalorder %s1045_s3, 0  ;;  %s552_s21 = smul.u32 5120, %s775_s13 }
  0x93   : > { %s418_s6 = sshll.u32 %s928_s20, 4  ;;  %s736_s27 = smov [#allocation7]   ;;  %s1058_s6 = int_to_ptr.vmem [resolvable:$true] %s418_s6 }
  0x94   : > { %s1056_s16 = scalar_lea.hbm %s1105_s2, %s552_s21  ;;  %s658_s23 = scalar_lea.vmem %s1058_s6, %s1045_s3 }
  0x95   : > { %p659_p3 = scmp.ne.s32.totalorder %s1058_s6, %s658_s23  ;;  %s662_s19 = sshll.u32 %s736_s27, 4  ;;  %s663_s19 = int_to_ptr.vmem [resolvable:$false] %s662_s19 }
  0x96   : > { %s664_s13 = scalar_lea.vmem %s663_s19, 10240  ;;  %p665_p9 = scmp.lt.s32.totalorder %s1058_s6, %s663_s19 }
  0x97   : > { %p660_p4 = pnand %p659_p3, %p534_p1  ;;  %p666_p10 = scmp.lt.s32.totalorder %s664_s13, %s658_s23 }
  0x99   : > { %p661_p7 = pneg %p660_p4  ;;  %p667_p13 = por %p666_p10, %p665_p9 }
  0x9b   : > { %p668_p8 = pnand %p667_p13, %p661_p7 }
  0x9d   : > { %671 = shalt.err (!%p668_p8)
}
  0x9e   : > { %s672_s7 = scalar_lea.hbm %s1056_s16, %s1045_s3  ;;  %s676_s17 = scalar_lea.hbm %s1105_s2, 18944 }
  0x9f   : > { %p673_p11 = scmp.ne.s32.totalorder %s1056_s16, %s672_s7  ;;  %p677_p0 = scmp.lt.u32.totalorder %s1056_s16, %s1105_s2 }
  0xa0   : > { %p678_p6 = scmp.lt.u32.totalorder %s676_s17, %s672_s7  ;;  %p680_p3 = scmp.lt.u32.totalorder %s672_s7, %s1056_s16 }
  0xa1   : > { %p674_p2 = pnand %p673_p11, %p534_p1 }
  0xa2   : > { %p679_p5 = por %p678_p6, %p677_p0 }
  0xa3   : > { %p675_p12 = pneg %p674_p2 }
  0xa4   : > { %p681_p4 = por %p680_p3, %p679_p5 }
  0xa6   : > { %p682_p7 = pnand %p681_p4, %p675_p12 }
  0xa8   : > { %685 = shalt.err (!%p682_p7)
}
  0xa9   : > { %s737_s25 = smov 512   ;;  %s738_s30 = smov 32  }
  0xaa   : > { %424 = dma.vmem_to_hbm [thread:$0]  (%p534_p1), %s1058_s6, %s1045_s3, %s1056_s16, %s397_s29, %s737_s25, %s737_s25, %s738_s30  }
  0xab PF: > { %p563_p9 = scmp.ge.s32.totalorder %s728_s12, 2  ;;  %s433_s5 = sand.u32 1, %s716_s9  }
  0xac   : > { %p1111_p10 = scmp.ne.s32.totalorder %s1109_s22, 0  ;;  %s434_s21 = scalar_lea.sflag [#allocation4], %s433_s5 }
  0xae   : > { %p560_p13 = pnand %p563_p9, %p1111_p10 }
  0xb0   : > { %711 = dma.done.wait (!%p560_p13), %s434_s21, 5120  }
  0xb1   : > { %713 = vsyncadd (!%p560_p13), %s434_s21, 4294962176  ;;  %p18_p8 = scmp.ge.s32.totalorder %s779_s15, 6   ;;  %s1112_s9 = smov %s720_s10 }
  0xb2   : > { %s1113_s10 = smov %s724_s11  ;;  %s1114_s11 = smov %s791_s18 }
  0xb3   : > { %s1115_s12 = smov %s779_s15  ;;  %20 = sbr.rel (!%p18_p8) target bundleno = 7 (0x7), region = 86 }
  0xba   :  { %439 = vsyncpa [#allocation3], 1 }
  0xbb   :  { %441 = vsyncpa [#allocation3 + $0x1], 1 }
  0xbc   :  { %442 = vsyncpa [#allocation6], 1 }
  0xbd   :  { %444 = vsyncpa [#allocation6 + $0x1], 1 }
  0xbe   :  { %445 = vsyncpa [#allocation4], 1 }
  0xbf   :  { %447 = vsyncpa [#allocation4 + $0x1], 1 }

</bundles_post_ra>
